<compile_context>
chip_gen: v7x
topology: tpu7x:2x2x1
jax: 0.10.0
libtpu: 0.0.40
codegen_flags: <defaults>
</compile_context>

<pallas_src>
import jax
import jax.numpy as jnp
from jax.experimental import pallas as pl
from jax.experimental.pallas import tpu as pltpu


def _round_up(x, m):
    return ((x + m - 1) // m) * m


def critic_kernel(x_ref, w1_ref, b1_ref, w2_ref, b2_ref,
                  w3_ref, b3_ref, w4_ref, b4_ref, o_ref):
    # Layer 1: (TM, F) @ (F, 32) + (1, 32) -> ReLU
    h1 = jnp.dot(x_ref[...], w1_ref[...], preferred_element_type=jnp.float32)
    h1 = jnp.maximum(h1 + b1_ref[...], 0.0)
    # Layer 2: (TM, 32) @ (32, 128) + (1, 128) -> ReLU
    h2 = jnp.dot(h1, w2_ref[...], preferred_element_type=jnp.float32)
    h2 = jnp.maximum(h2 + b2_ref[...], 0.0)
    # Layer 3: (TM, 128) @ (128, 64) + (1, 64) -> ReLU
    h3 = jnp.dot(h2, w3_ref[...], preferred_element_type=jnp.float32)
    h3 = jnp.maximum(h3 + b3_ref[...], 0.0)
    # Value head, lane-dense: contract (1, 64) with (TM, 64) over the 64-dim
    # to produce a (1, TM) row directly -> unmasked full-lane stores.
    out_row = jax.lax.dot_general(
        w4_ref[...], h3,
        dimension_numbers=(((1,), (1,)), ((), ())),
        preferred_element_type=jnp.float32)
    # b4 is a scalar read from SMEM; broadcasts across the (1, TM) row.
    o_ref[...] = (out_row + b4_ref[0, 0]).astype(o_ref.dtype)


def critic_forward(x, params, *, tm=2048):
    """x: (B, n_features) float32. params: tuple of (w, b) pairs.
    Weights are stored as (in_features, out_features); the value-head weight
    w4 (64, 1) is presented to the kernel as a (1, 64) row."""
    (w1, b1), (w2, b2), (w3, b3), (w4, b4) = params
    B, F = x.shape

    tm = _round_up(tm, 128)
    # Number of batch tiles:
    #  - at least cdiv(B, tm) so TM never exceeds the requested cap,
    #  - at least 2 for reasonably large batches so the "parallel" grid axis
    #    can split across both TensorCores on v7x.
    n_tiles = max(pl.cdiv(B, tm), 2 if B >= 256 else 1)
    # Balance the tile size across tiles (minimal pad waste) and round up to a
    # multiple of 128 so the (1, TM) output row is fully lane-dense.
    TM = _round_up(pl.cdiv(B, n_tiles), 128)
    B_pad = n_tiles * TM
    if B_pad != B:
        x = jnp.pad(x, ((0, B_pad - B), (0, 0)))

    w4_row = w4.reshape(1, 64)                      # (64, 1) -> (1, 64)
    b4_s = b4.reshape(1, 1).astype(jnp.float32)     # scalar for SMEM

    # Weights / hidden biases: full-array blocks, constant index -> resident.
    const = lambda a: pl.BlockSpec(a.shape, lambda i: (0, 0),
                                   memory_space=pltpu.VMEM)

    out = pl.pallas_call(
        critic_kernel,
        out_shape=jax.ShapeDtypeStruct((n_tiles, TM), jnp.float32),
        grid=(n_tiles,),
        in_specs=[
            pl.BlockSpec((TM, F), lambda i: (i, 0), memory_space=pltpu.VMEM),
            const(w1), const(b1),
            const(w2), const(b2),
            const(w3), const(b3),
            const(w4_row),
            pl.BlockSpec((1, 1), lambda i: (0, 0), memory_space=pltpu.SMEM),
        ],
        out_specs=pl.BlockSpec((1, TM), lambda i: (i, 0),
                               memory_space=pltpu.VMEM),
        compiler_params=pltpu.CompilerParams(
            dimension_semantics=("parallel",),
            vmem_limit_bytes=32 * 1024 * 1024,
        ),
    )(x, w1, b1, w2, b2, w3, b3, w4_row, b4_s)

    # (n_tiles, TM) -> (B, 1), dropping pad rows.
    return out.reshape(-1)[:B].reshape(B, 1)


def init_params(key, n_features):
    """Deterministic init mirroring the PyTorch module's layer shapes.
    Weights stored transposed relative to torch (in, out) for x @ W."""
    dims = [(n_features, 32), (32, 128), (128, 64), (64, 1)]
    params = []
    for i, (fin, fout) in enumerate(dims):
        kw, kb, key = jax.random.split(jax.random.fold_in(key, i), 3)
        bound = 1.0 / jnp.sqrt(fin)
        w = jax.random.uniform(kw, (fin, fout), jnp.float32, -bound, bound)
        b = jax.random.uniform(kb, (1, fout), jnp.float32, -bound, bound)
        params.append((w, b))
    return tuple(params)


def critic_ref(x, params):
    """Pure-JAX reference of the same forward pass."""
    h = x
    for i, (w, b) in enumerate(params):
        h = h @ w + b
        if i < len(params) - 1:
            h = jnp.maximum(h, 0.0)
    return h


if __name__ == "__main__":
    key = jax.random.PRNGKey(0)
    n_features = 4   # e.g. CartPole observation dim
    batch = 8

    kx, kp = jax.random.split(key)
    x = jax.random.normal(kx, (batch, n_features), jnp.float32)
    params = init_params(kp, n_features)

    out = critic_forward(x, params)
    out = jax.block_until_ready(out)
    ref = critic_ref(x, params)
    assert out.shape == (batch, 1), out.shape
    assert jnp.allclose(out, ref, atol=1e-5, rtol=1e-5), (out, ref)

    # Multi-tile / padded-batch path (grid > 1, TM does not divide B).
    big_batch = 3000
    xb = jax.random.normal(jax.random.fold_in(kx, 1),
                           (big_batch, n_features), jnp.float32)
    out_b = jax.block_until_ready(critic_forward(xb, params, tm=1024))
    ref_b = critic_ref(xb, params)
    assert out_b.shape == (big_batch, 1), out_b.shape
    assert jnp.allclose(out_b, ref_b, atol=1e-5, rtol=1e-5)

    print("KERNEL_OK")
</pallas_src>

<mosaic_0001>
module attributes {stable_mosaic.version = 11 : i64} {
  func.func @critic_kernel(%arg0: i32, %arg1: memref<128x4xf32, #tpu.memory_space<vmem>>, %arg2: memref<4x32xf32, #tpu.memory_space<vmem>>, %arg3: memref<1x32xf32, #tpu.memory_space<vmem>>, %arg4: memref<32x128xf32, #tpu.memory_space<vmem>>, %arg5: memref<1x128xf32, #tpu.memory_space<vmem>>, %arg6: memref<128x64xf32, #tpu.memory_space<vmem>>, %arg7: memref<1x64xf32, #tpu.memory_space<vmem>>, %arg8: memref<1x64xf32, #tpu.memory_space<vmem>>, %arg9: memref<1x1xf32, #tpu.memory_space<smem>>, %arg10: memref<1x128xf32, #tpu.memory_space<vmem>>) attributes {dimension_semantics = [#tpu.dimension_semantics<parallel>], iteration_bounds = array<i64: 1>, scalar_prefetch = 0 : i64, scratch_operands = 0 : i64, tpu.core_type = #tpu.core_type<tc>, window_params = [{transform_indices = @transform_0, window_bounds = array<i64: 128, 4>}, {pipeline_mode = #tpu.pipeline_mode<synchronous>, transform_indices = @transform_1, window_bounds = array<i64: 4, 32>}, {pipeline_mode = #tpu.pipeline_mode<synchronous>, transform_indices = @transform_2, window_bounds = array<i64: 1, 32>}, {pipeline_mode = #tpu.pipeline_mode<synchronous>, transform_indices = @transform_3, window_bounds = array<i64: 32, 128>}, {pipeline_mode = #tpu.pipeline_mode<synchronous>, transform_indices = @transform_4, window_bounds = array<i64: 1, 128>}, {pipeline_mode = #tpu.pipeline_mode<synchronous>, transform_indices = @transform_5, window_bounds = array<i64: 128, 64>}, {pipeline_mode = #tpu.pipeline_mode<synchronous>, transform_indices = @transform_6, window_bounds = array<i64: 1, 64>}, {pipeline_mode = #tpu.pipeline_mode<synchronous>, transform_indices = @transform_7, window_bounds = array<i64: 1, 64>}, {transform_indices = @transform_8, window_bounds = array<i64: 1, 1>}, {transform_indices = @transform_9, window_bounds = array<i64: 1, 128>}]} {
    %c0 = arith.constant 0 : index
    %c0_0 = arith.constant 0 : index
    %0 = vector.load %arg1[%c0, %c0_0] : memref<128x4xf32, #tpu.memory_space<vmem>>, vector<128x4xf32>
    %c0_1 = arith.constant 0 : index
    %c0_2 = arith.constant 0 : index
    %1 = vector.load %arg2[%c0_1, %c0_2] : memref<4x32xf32, #tpu.memory_space<vmem>>, vector<4x32xf32>
    %cst = arith.constant dense<0.000000e+00> : vector<128x32xf32>
    %2 = tpu.matmul %0, %1, %cst {dimension_numbers = #tpu.dot_dimension_numbers<[1], [0], [0], [1], [0, 0, 1, 1], [], []>} : vector<128x4xf32>, vector<4x32xf32>, vector<128x32xf32> -> vector<128x32xf32>
    %c0_3 = arith.constant 0 : index
    %c0_4 = arith.constant 0 : index
    %3 = vector.load %arg3[%c0_3, %c0_4] : memref<1x32xf32, #tpu.memory_space<vmem>>, vector<1x32xf32>
    %4 = vector.broadcast %3 : vector<1x32xf32> to vector<128x32xf32>
    %5 = arith.addf %2, %4 : vector<128x32xf32>
    %cst_5 = arith.constant 0.000000e+00 : f32
    %6 = vector.broadcast %cst_5 : f32 to vector<128x32xf32>
    %7 = arith.maximumf %5, %6 : vector<128x32xf32>
    %c0_6 = arith.constant 0 : index
    %c0_7 = arith.constant 0 : index
    %8 = vector.load %arg4[%c0_6, %c0_7] : memref<32x128xf32, #tpu.memory_space<vmem>>, vector<32x128xf32>
    %cst_8 = arith.constant dense<0.000000e+00> : vector<128x128xf32>
    %9 = tpu.matmul %7, %8, %cst_8 {dimension_numbers = #tpu.dot_dimension_numbers<[1], [0], [0], [1], [0, 0, 1, 1], [], []>} : vector<128x32xf32>, vector<32x128xf32>, vector<128x128xf32> -> vector<128x128xf32>
    %c0_9 = arith.constant 0 : index
    %c0_10 = arith.constant 0 : index
    %10 = vector.load %arg5[%c0_9, %c0_10] : memref<1x128xf32, #tpu.memory_space<vmem>>, vector<1x128xf32>
    %11 = vector.broadcast %10 : vector<1x128xf32> to vector<128x128xf32>
    %12 = arith.addf %9, %11 : vector<128x128xf32>
    %cst_11 = arith.constant 0.000000e+00 : f32
    %13 = vector.broadcast %cst_11 : f32 to vector<128x128xf32>
    %14 = arith.maximumf %12, %13 : vector<128x128xf32>
    %c0_12 = arith.constant 0 : index
    %c0_13 = arith.constant 0 : index
    %15 = vector.load %arg6[%c0_12, %c0_13] : memref<128x64xf32, #tpu.memory_space<vmem>>, vector<128x64xf32>
    %cst_14 = arith.constant dense<0.000000e+00> : vector<128x64xf32>
    %16 = tpu.matmul %14, %15, %cst_14 {dimension_numbers = #tpu.dot_dimension_numbers<[1], [0], [0], [1], [0, 0, 1, 1], [], []>} : vector<128x128xf32>, vector<128x64xf32>, vector<128x64xf32> -> vector<128x64xf32>
    %c0_15 = arith.constant 0 : index
    %c0_16 = arith.constant 0 : index
    %17 = vector.load %arg7[%c0_15, %c0_16] : memref<1x64xf32, #tpu.memory_space<vmem>>, vector<1x64xf32>
    %18 = vector.broadcast %17 : vector<1x64xf32> to vector<128x64xf32>
    %19 = arith.addf %16, %18 : vector<128x64xf32>
    %cst_17 = arith.constant 0.000000e+00 : f32
    %20 = vector.broadcast %cst_17 : f32 to vector<128x64xf32>
    %21 = arith.maximumf %19, %20 : vector<128x64xf32>
    %c0_18 = arith.constant 0 : index
    %c0_19 = arith.constant 0 : index
    %22 = vector.load %arg8[%c0_18, %c0_19] : memref<1x64xf32, #tpu.memory_space<vmem>>, vector<1x64xf32>
    %cst_20 = arith.constant dense<0.000000e+00> : vector<1x128xf32>
    %23 = tpu.matmul %22, %21, %cst_20 {dimension_numbers = #tpu.dot_dimension_numbers<[1], [1], [0], [0], [0, 0, 1, 0], [], []>} : vector<1x64xf32>, vector<128x64xf32>, vector<1x128xf32> -> vector<1x128xf32>
    %c0_21 = arith.constant 0 : index
    %c0_22 = arith.constant 0 : index
    %24 = memref.load %arg9[%c0_21, %c0_22] : memref<1x1xf32, #tpu.memory_space<smem>>
    %25 = vector.broadcast %24 : f32 to vector<1x128xf32>
    %26 = arith.addf %23, %25 : vector<1x128xf32>
    %c0_23 = arith.constant 0 : index
    %c0_24 = arith.constant 0 : index
    %27 = vector.load %arg10[%c0_23, %c0_24] : memref<1x128xf32, #tpu.memory_space<vmem>>, vector<1x128xf32>
    tpu.vector_store %arg10[%c0_23, %c0_24], %26 {strides = array<i32>} : memref<1x128xf32, #tpu.memory_space<vmem>>, vector<1x128xf32>,
    return
  }
  func.func @transform_0(%arg0: i32) -> (i32, i32) {
    %c0_i32 = arith.constant 0 : i32
    %c0_i32_0 = arith.constant 0 : i32
    return %arg0, %c0_i32 : i32, i32
  }
  func.func @transform_1(%arg0: i32) -> (i32, i32) {
    %c0_i32 = arith.constant 0 : i32
    %c0_i32_0 = arith.constant 0 : i32
    %c0_i32_1 = arith.constant 0 : i32
    return %c0_i32, %c0_i32_0 : i32, i32
  }
  func.func @transform_2(%arg0: i32) -> (i32, i32) {
    %c0_i32 = arith.constant 0 : i32
    %c0_i32_0 = arith.constant 0 : i32
    %c0_i32_1 = arith.constant 0 : i32
    return %c0_i32, %c0_i32_0 : i32, i32
  }
  func.func @transform_3(%arg0: i32) -> (i32, i32) {
    %c0_i32 = arith.constant 0 : i32
    %c0_i32_0 = arith.constant 0 : i32
    %c0_i32_1 = arith.constant 0 : i32
    return %c0_i32, %c0_i32_0 : i32, i32
  }
  func.func @transform_4(%arg0: i32) -> (i32, i32) {
    %c0_i32 = arith.constant 0 : i32
    %c0_i32_0 = arith.constant 0 : i32
    %c0_i32_1 = arith.constant 0 : i32
    return %c0_i32, %c0_i32_0 : i32, i32
  }
  func.func @transform_5(%arg0: i32) -> (i32, i32) {
    %c0_i32 = arith.constant 0 : i32
    %c0_i32_0 = arith.constant 0 : i32
    %c0_i32_1 = arith.constant 0 : i32
    return %c0_i32, %c0_i32_0 : i32, i32
  }
  func.func @transform_6(%arg0: i32) -> (i32, i32) {
    %c0_i32 = arith.constant 0 : i32
    %c0_i32_0 = arith.constant 0 : i32
    %c0_i32_1 = arith.constant 0 : i32
    return %c0_i32, %c0_i32_0 : i32, i32
  }
  func.func @transform_7(%arg0: i32) -> (i32, i32) {
    %c0_i32 = arith.constant 0 : i32
    %c0_i32_0 = arith.constant 0 : i32
    %c0_i32_1 = arith.constant 0 : i32
    return %c0_i32, %c0_i32_0 : i32, i32
  }
  func.func @transform_8(%arg0: i32) -> (i32, i32) {
    %c0_i32 = arith.constant 0 : i32
    %c0_i32_0 = arith.constant 0 : i32
    %c0_i32_1 = arith.constant 0 : i32
    return %c0_i32, %c0_i32_0 : i32, i32
  }
  func.func @transform_9(%arg0: i32) -> (i32, i32) {
    %c0_i32 = arith.constant 0 : i32
    %c0_i32_0 = arith.constant 0 : i32
    return %arg0, %c0_i32 : i32, i32
  }
}

</mosaic_0001>

<bundles_post_ra>
// kernel: tpu_custom_call.1
= control target key start
LH: loop header
LB: loop body
LE: loop exit
PB: predicated region body
PF: predicated region fallthrough
CT: control target
= control target key end

     0   :  { %vm107_vm0 = vcmask 1043456   ;;  %vm58_vm1 = vcmask 31744   ;;  %s1460_s0 = inlined_call_operand.vmem [shape: f32[128,4], index: 0, kind: input, shape index: {}]   ;;  %s1461_s1 = inlined_call_operand.vmem [shape: f32[4,32], index: 1, kind: input, shape index: {}]   ;;  %s1462_s2 = inlined_call_operand.vmem [shape: f32[1,32], index: 2, kind: input, shape index: {}]   ;;  %s1463_s3 = inlined_call_operand.vmem [shape: f32[32,128], index: 3, kind: input, shape index: {}]   ;;  %s1464_s4 = inlined_call_operand.vmem [shape: f32[1,128], index: 4, kind: input, shape index: {}]   ;;  %s1465_s5 = inlined_call_operand.vmem [shape: f32[128,64], index: 5, kind: input, shape index: {}]   ;;  %s1466_s6 = inlined_call_operand.vmem [shape: f32[1,64], index: 6, kind: input, shape index: {}]   ;;  %s1467_s7 = inlined_call_operand.vmem [shape: f32[1,64], index: 7, kind: input, shape index: {}]   ;;  %s1468_s8 = inlined_call_operand.<no memory space> [shape: f32[1,1], index: 8, kind: input, shape index: {}]   ;;  %s1469_s9 = inlined_call_operand.hbm [shape: f32[1,128], index: 9, kind: output, shape index: {}]  }
   0x1   :  { %v50_v0 = vld [vmem:[%s1461_s1] sm:$0xf]  ;;  %v35_v2 = vld [vmem:[%s1460_s0 + $0x8] sm:$0xff]  ;;  %v36_v3 = vld [vmem:[%s1460_s0 + $0x10] sm:$0xff] }
   0x2   :  { %v34_v1 = vld [vmem:[%s1460_s0] sm:$0xff]  ;;  %956 = vmatprep.subr.msk.mxu0 %vm107_vm0, %v50_v0  ;;  %v37_v4 = vld [vmem:[%s1460_s0 + $0x18] sm:$0xff]  ;;  %v273_v7 = vld [vmem:[%s1463_s3 + $0x8] sm:$0xff] }
   0x3   :  { %958 = vmatprep.mubr.msk.f32.mxu0 %vm58_vm1, %v34_v1  ;;  %957 = vmatpush3.msk.msra.mxu0 %vm107_vm0, %v50_v0  ;;  %v38_v5 = vld [vmem:[%s1460_s0 + $0x20] sm:$0xff] }
   0x4   :  { %959 = vmatmul.mubr.msk.f32.vlgmr.msra.gmra.mrb[0].mxu0 %vm58_vm1, %v35_v2  ;;  %v272_v6 = vld [vmem:[%s1463_s3] sm:$0xff] }
   0x5   :  { %961 = vmatprep.mubr.msk.f32.mxu0 %vm58_vm1, %v36_v3 }
   0x6   :  { %15 = vsyncpa [#allocation4], 0  ;;  %v1105_v8 = vpack.c.bf16 %v273_v7, %v272_v6  ;;  %v39_v9 = vld [vmem:[%s1460_s0 + $0x28] sm:$0xff]  ;;  %v40_v10 = vld [vmem:[%s1460_s0 + $0x30] sm:$0xff]  ;;  %vm283_vm2 = vcmask 261120   ;;  %vm1206_vm3 = vmmov 0  }
   0x7   :  { %v41_v11 = vld [vmem:[%s1460_s0 + $0x38] sm:$0xff]  ;;  %v42_v12 = vld [vmem:[%s1460_s0 + $0x40] sm:$0xff]  ;;  %v43_v13 = vld [vmem:[%s1460_s0 + $0x48] sm:$0xff]  ;;  %vm680_vm4 = vcmask 523264   ;;  %s1208_s18 = smov [#allocation3]  }
   0x8   :  { %962 = vmatmul.mubr.msk.f32.gmra.mrb[2].mxu0 %vm58_vm1, %v37_v4  ;;  %1106 = vmatprep.subr.bf16.mxu1 %v1105_v8  ;;  %v44_v14 = vld [vmem:[%s1460_s0 + $0x50] sm:$0xff]  ;;  %v45_v15 = vld [vmem:[%s1460_s0 + $0x58] sm:$0xff]  ;;  %v46_v16 = vld [vmem:[%s1460_s0 + $0x60] sm:$0xff]  ;;  %s809_s19 = sshll.u32 %s1208_s18, 4  ;;  %s810_s19 = int_to_ptr.vmem [resolvable:$true] %s809_s19 }
   0x9   :  { %964 = vmatprep.mubr.msk.f32.mxu0 %vm58_vm1, %v38_v5  ;;  %1108 = vmatpush3.bf16.msra.mxu1 %v1105_v8  ;;  %v47_v17 = vld [vmem:[%s1460_s0 + $0x68] sm:$0xff]  ;;  %v48_v18 = vld [vmem:[%s1460_s0 + $0x70] sm:$0xff]  ;;  %v49_v19 = vld [vmem:[%s1460_s0 + $0x78] sm:$0xff]  ;;  %s1181_s20 = scalar_lea.vmem %s810_s19, 16  ;;  %s1185_s21 = scalar_lea.vmem %s810_s19, 32 }
   0xa   :  { %v274_v20 = vld [vmem:[%s1463_s3 + $0x10] sm:$0xff]  ;;  %v275_v21 = vld [vmem:[%s1463_s3 + $0x18] sm:$0xff]  ;;  %v493_v23 = vld [vmem:[%s1465_s5] sm:$0xff]  ;;  %p1182_p0 = scmp.ne.s32.totalorder %s810_s19, %s1181_s20  ;;  %p1186_p1 = scmp.lt.s32.totalorder %s810_s19, %s810_s19 }
   0xb   :  { %v1109_v22 = vpack.c.bf16 %v275_v21, %v274_v20  ;;  %v494_v24 = vld [vmem:[%s1465_s5 + $0x8] sm:$0xff]  ;;  %v495_v25 = vld [vmem:[%s1465_s5 + $0x10] sm:$0xff]  ;;  %v496_v27 = vld [vmem:[%s1465_s5 + $0x18] sm:$0xff]  ;;  %p1187_p2 = scmp.lt.s32.totalorder %s1185_s21, %s1181_s20 }
   0xc   :  { %965 = vmatmul.mubr.msk.f32.gmra.mrb[4].mxu0 %vm58_vm1, %v39_v9  ;;  %v1113_v26 = vpack.c.bf16 %v494_v24, %v493_v23  ;;  %v1117_v28 = vpack.c.bf16 %v496_v27, %v495_v25  ;;  %v497_v29 = vld [vmem:[%s1465_s5 + $0x20] sm:$0xff]  ;;  %v498_v30 = vld [vmem:[%s1465_s5 + $0x28] sm:$0xff]  ;;  %v499_v32 = vld [vmem:[%s1465_s5 + $0x30] sm:$0xff] }
   0xd   :  { %967 = vmatprep.mubr.msk.f32.mxu0 %vm58_vm1, %v40_v10  ;;  %1110 = vmatprep.subr.bf16.mxu1 %v1109_v22  ;;  %v1121_v31 = vpack.c.bf16 %v498_v30, %v497_v29  ;;  %v500_v33 = vld [vmem:[%s1465_s5 + $0x38] sm:$0xff]  ;;  %v501_v35 = vld [vmem:[%s1465_s5 + $0x40] sm:$0xff]  ;;  %v502_v36 = vld [vmem:[%s1465_s5 + $0x48] sm:$0xff]  ;;  %p1188_p3 = por %p1187_p2, %p1186_p1 }
   0xe   :  { %1112 = vmatpush3.bf16.msra.mxu1 %v1109_v22  ;;  %1114 = vmatprep.subr.bf16.mxu0 %v1113_v26  ;;  %v1125_v34 = vpack.c.bf16 %v500_v33, %v499_v32  ;;  %v1129_v37 = vpack.c.bf16 %v502_v36, %v501_v35  ;;  %v503_v38 = vld [vmem:[%s1465_s5 + $0x50] sm:$0xff]  ;;  %v504_v39 = vld [vmem:[%s1465_s5 + $0x58] sm:$0xff]  ;;  %v505_v41 = vld [vmem:[%s1465_s5 + $0x60] sm:$0xff] }
   0xf   :  { %1116 = vmatpush3.bf16.msra.mxu0 %v1113_v26  ;;  %v1133_v40 = vpack.c.bf16 %v504_v39, %v503_v38  ;;  %v506_v42 = vld [vmem:[%s1465_s5 + $0x68] sm:$0xff]  ;;  %v817_v44 = vld [vmem:[%s1462_s2] ss:$0 sm:$0xff]  ;;  %v507_v29 = vld [vmem:[%s1465_s5 + $0x70] sm:$0xff]  ;;  %p1189_p4 = pnand %p1188_p3, %p1182_p0 }
  0x10   :  { %968 = vmatmul.mubr.msk.f32.gmra.mrb[6].mxu0 %vm58_vm1, %v41_v11  ;;  %1118 = vmatprep.subr.bf16.mxu0 %v1117_v28  ;;  %v1137_v43 = vpack.c.bf16 %v506_v42, %v505_v41  ;;  %v508_v30 = vld [vmem:[%s1465_s5 + $0x78] sm:$0xff]  ;;  %v835_v32 = vld [vmem:[%s1464_s4] ss:$0 sm:$0xff]  ;;  %vm1414_vm5 = vmpackc.low %vm680_vm4, %vm680_vm4 }
  0x11   :  { %970 = vmatprep.mubr.msk.f32.mxu0 %vm58_vm1, %v42_v12 }
  0x13   :  { %1120 = vmatpush3.bf16.msra.mxu0 %v1117_v28 }
  0x14   :  { %971 = vmatmul.mubr.msk.f32.gmra.mrb[8].mxu0 %vm58_vm1, %v43_v13  ;;  %1122 = vmatprep.subr.bf16.mxu0 %v1121_v31 }
  0x15   :  { %973 = vmatprep.mubr.msk.f32.mxu0 %vm58_vm1, %v44_v14 }
  0x17   :  { %1124 = vmatpush3.bf16.msra.mxu0 %v1121_v31  ;;  %v1141_v31 = vpack.c.bf16 %v508_v30, %v507_v29 }
  0x18   :  { %974 = vmatmul.mubr.msk.f32.gmra.mrb[10].mxu0 %vm58_vm1, %v45_v15  ;;  %1126 = vmatprep.subr.bf16.mxu0 %v1125_v34 }
  0x19   :  { %976 = vmatprep.mubr.msk.f32.mxu0 %vm58_vm1, %v46_v16 }
  0x1b   :  { %1128 = vmatpush3.bf16.msra.mxu0 %v1125_v34 }
  0x1c   :  { %977 = vmatmul.mubr.msk.f32.gmra.mrb[12].mxu0 %vm58_vm1, %v47_v17  ;;  %1130 = vmatprep.subr.bf16.mxu0 %v1129_v37 }
  0x1d   :  { %979 = vmatprep.mubr.msk.f32.mxu0 %vm58_vm1, %v48_v18 }
  0x1f   :  { %1132 = vmatpush3.bf16.msra.mxu0 %v1129_v37 }
  0x20   :  { %980 = vmatmul.mubr.msk.f32.gmra.mrb[14].mxu0 %vm58_vm1, %v49_v19  ;;  %1134 = vmatprep.subr.bf16.mxu0 %v1133_v40 }
  0x23   :  { %1136 = vmatpush3.bf16.msra.mxu0 %v1133_v40 }
  0x24   :  { %1138 = vmatprep.subr.bf16.mxu0 %v1137_v43 }
  0x27   :  { %1140 = vmatpush3.bf16.msra.mxu0 %v1137_v43 }
  0x28   :  { %1142 = vmatprep.subr.bf16.mxu0 %v1141_v31 }
  0x2b   :  { %1144 = vmatpush3.bf16.msra.mxu0 %v1141_v31 }
  0xd7   :  { %v960_v45 = vpop.f32.mrb[0].mxu0 }
  0xd8   :  { %v183_v46 = vadd.f32 %v960_v45, %v817_v44  ;;  %v177_v47 = vpop.f32.mrb[1].mxu0 }
  0xd9   :  { %v178_v48 = vadd.f32 %v817_v44, %v177_v47 }
  0xda   :  { %v257_v51 = vmax.f32 %v183_v46, 0.0 }
  0xdb   :  { %v256_v49 = vmax.f32 %v178_v48, 0.0  ;;  %v963_v50 = vpop.f32.mrb[2].mxu0 }
  0xdc   :  { %v193_v52 = vadd.f32 %v963_v50, %v817_v44  ;;  %v187_v53 = vpop.f32.mrb[3].mxu0 }
  0xdd   :  { %v188_v54 = vadd.f32 %v817_v44, %v187_v53  ;;  %990 = vmatprep.mubr.msk.f32.mxu1 %vm283_vm2, %v256_v49 }
  0xde   :  { %v259_v55 = vmax.f32 %v193_v52, 0.0  ;;  %991 = vmatmul.mubr.msk.f32.vlgmr.msra.gmra.mrb[0].mxu1 %vm283_vm2, %v257_v51 }
  0xdf   :  { %v258_v56 = vmax.f32 %v188_v54, 0.0  ;;  %v966_v57 = vpop.f32.mrb[4].mxu0 }
  0xe0   :  { %v203_v58 = vadd.f32 %v966_v57, %v817_v44  ;;  %v197_v59 = vpop.f32.mrb[5].mxu0 }
  0xe1   :  { %993 = vmatprep.mubr.msk.f32.mxu1 %vm283_vm2, %v258_v56  ;;  %v198_v60 = vadd.f32 %v817_v44, %v197_v59 }
  0xe2   :  { %v261_v61 = vmax.f32 %v203_v58, 0.0  ;;  %994 = vmatmul.mubr.msk.f32.gmra.mrb[2].mxu1 %vm283_vm2, %v259_v55 }
  0xe3   :  { %v260_v62 = vmax.f32 %v198_v60, 0.0  ;;  %v969_v63 = vpop.f32.mrb[6].mxu0 }
  0xe4   :  { %v213_v0 = vadd.f32 %v969_v63, %v817_v44  ;;  %v207_v1 = vpop.f32.mrb[7].mxu0 }
  0xe5   :  { %996 = vmatprep.mubr.msk.f32.mxu1 %vm283_vm2, %v260_v62  ;;  %v208_v2 = vadd.f32 %v817_v44, %v207_v1 }
  0xe6   :  { %997 = vmatmul.mubr.msk.f32.gmra.mrb[4].mxu1 %vm283_vm2, %v261_v61  ;;  %v263_v3 = vmax.f32 %v213_v0, 0.0 }
  0xe7   :  { %v262_v4 = vmax.f32 %v208_v2, 0.0  ;;  %v972_v5 = vpop.f32.mrb[8].mxu0 }
  0xe8   :  { %v223_v6 = vadd.f32 %v972_v5, %v817_v44  ;;  %v217_v7 = vpop.f32.mrb[9].mxu0 }
  0xe9   :  { %999 = vmatprep.mubr.msk.f32.mxu1 %vm283_vm2, %v262_v4  ;;  %v218_v8 = vadd.f32 %v817_v44, %v217_v7 }
  0xea   :  { %1000 = vmatmul.mubr.msk.f32.gmra.mrb[6].mxu1 %vm283_vm2, %v263_v3  ;;  %v265_v9 = vmax.f32 %v223_v6, 0.0 }
  0xeb   :  { %v264_v10 = vmax.f32 %v218_v8, 0.0  ;;  %v975_v11 = vpop.f32.mrb[10].mxu0 }
  0xec   :  { %v233_v12 = vadd.f32 %v975_v11, %v817_v44  ;;  %v227_v13 = vpop.f32.mrb[11].mxu0 }
  0xed   :  { %1002 = vmatprep.mubr.msk.f32.mxu1 %vm283_vm2, %v264_v10  ;;  %v228_v14 = vadd.f32 %v817_v44, %v227_v13 }
  0xee   :  { %1003 = vmatmul.mubr.msk.f32.gmra.mrb[8].mxu1 %vm283_vm2, %v265_v9  ;;  %v267_v15 = vmax.f32 %v233_v12, 0.0 }
  0xef   :  { %v266_v16 = vmax.f32 %v228_v14, 0.0  ;;  %v978_v17 = vpop.f32.mrb[12].mxu0 }
  0xf0   :  { %v243_v18 = vadd.f32 %v978_v17, %v817_v44  ;;  %v237_v19 = vpop.f32.mrb[13].mxu0  ;;  %v1205_v17 = vmov 0.0|0.0  }
  0xf1   :  { %1005 = vmatprep.mubr.msk.f32.mxu1 %vm283_vm2, %v266_v16  ;;  %v238_v20 = vadd.f32 %v817_v44, %v237_v19  ;;  %1145 = vmatprep.subr.bf16.mxu1 %v1205_v17  ;;  %v852_v19 = vld [vmem:[%s1466_s6] ss:$0 sm:$0xff] }
  0xf2   :  { %1006 = vmatmul.mubr.msk.f32.gmra.mrb[10].mxu1 %vm283_vm2, %v267_v15  ;;  %v269_v21 = vmax.f32 %v243_v18, 0.0  ;;  %v1207_v18 = vmov 0.0  }
  0xf3   :  { %v268_v22 = vmax.f32 %v238_v20, 0.0  ;;  %v981_v23 = vpop.f32.mrb[14].mxu0 }
  0xf4   :  { %v253_v24 = vadd.f32 %v981_v23, %v817_v44  ;;  %v247_v25 = vpop.f32.mrb[15].mxu0 }
  0xf5   :  { %1008 = vmatprep.mubr.msk.f32.mxu1 %vm283_vm2, %v268_v22  ;;  %v248_v26 = vadd.f32 %v817_v44, %v247_v25 }
  0xf6   :  { %1009 = vmatmul.mubr.msk.f32.gmra.mrb[12].mxu1 %vm283_vm2, %v269_v21  ;;  %v271_v27 = vmax.f32 %v253_v24, 0.0 }
  0xf7   :  { %v270_v28 = vmax.f32 %v248_v26, 0.0 }
  0xf9   :  { %1011 = vmatprep.mubr.msk.f32.mxu1 %vm283_vm2, %v270_v28 }
  0xfa   :  { %1012 = vmatmul.mubr.msk.f32.gmra.mrb[14].mxu1 %vm283_vm2, %v271_v27 }
  0xfb   :  { %1102 = vmatprep.mubr.msk.f32.mxu1 %vm1206_vm3, %v1207_v18 }
 0x1b1   :  { %v992_v33 = vpop.f32.mrb[0].mxu1 }
 0x1b2   :  { %v404_v34 = vadd.f32 %v992_v33, %v835_v32  ;;  %v398_v35 = vpop.f32.mrb[1].mxu1 }
 0x1b3   :  { %v399_v36 = vadd.f32 %v835_v32, %v398_v35 }
 0x1b4   :  { %v478_v39 = vmax.f32 %v404_v34, 0.0 }
 0x1b5   :  { %v477_v37 = vmax.f32 %v399_v36, 0.0  ;;  %v995_v38 = vpop.f32.mrb[2].mxu1 }
 0x1b6   :  { %v414_v40 = vadd.f32 %v995_v38, %v835_v32  ;;  %v408_v41 = vpop.f32.mrb[3].mxu1 }
 0x1b7   :  { %v409_v42 = vadd.f32 %v835_v32, %v408_v41  ;;  %1046 = vmatprep.mubr.f32.mxu0 %v477_v37 }
 0x1b8   :  { %v480_v43 = vmax.f32 %v414_v40, 0.0  ;;  %1047 = vmatmul.mubr.f32.vlgmr.msra.gmra.mrb[16].mxu0 %v478_v39 }
 0x1b9   :  { %v479_v44 = vmax.f32 %v409_v42, 0.0  ;;  %v998_v45 = vpop.f32.mrb[4].mxu1 }
 0x1ba   :  { %v424_v46 = vadd.f32 %v998_v45, %v835_v32  ;;  %v418_v47 = vpop.f32.mrb[5].mxu1 }
 0x1bb   :  { %1049 = vmatprep.mubr.f32.mxu0 %v479_v44  ;;  %v419_v48 = vadd.f32 %v835_v32, %v418_v47 }
 0x1bc   :  { %v482_v49 = vmax.f32 %v424_v46, 0.0  ;;  %1050 = vmatmul.mubr.f32.gmra.mrb[18].mxu0 %v480_v43 }
 0x1bd   :  { %v481_v50 = vmax.f32 %v419_v48, 0.0  ;;  %v1001_v51 = vpop.f32.mrb[6].mxu1 }
 0x1be   :  { %v434_v52 = vadd.f32 %v1001_v51, %v835_v32  ;;  %v428_v53 = vpop.f32.mrb[7].mxu1 }
 0x1bf   :  { %1052 = vmatprep.mubr.f32.mxu0 %v481_v50  ;;  %v429_v54 = vadd.f32 %v835_v32, %v428_v53 }
 0x1c0   :  { %1053 = vmatmul.mubr.f32.gmra.mrb[20].mxu0 %v482_v49  ;;  %v484_v55 = vmax.f32 %v434_v52, 0.0 }
 0x1c1   :  { %v483_v56 = vmax.f32 %v429_v54, 0.0  ;;  %v1004_v57 = vpop.f32.mrb[8].mxu1 }
 0x1c2   :  { %v444_v58 = vadd.f32 %v1004_v57, %v835_v32  ;;  %v438_v59 = vpop.f32.mrb[9].mxu1 }
 0x1c3   :  { %1055 = vmatprep.mubr.f32.mxu0 %v483_v56  ;;  %v439_v60 = vadd.f32 %v835_v32, %v438_v59 }
 0x1c4   :  { %1056 = vmatmul.mubr.f32.gmra.mrb[22].mxu0 %v484_v55  ;;  %v486_v61 = vmax.f32 %v444_v58, 0.0 }
 0x1c5   :  { %v485_v62 = vmax.f32 %v439_v60, 0.0  ;;  %v1007_v63 = vpop.f32.mrb[10].mxu1 }
 0x1c6   :  { %v454_v0 = vadd.f32 %v1007_v63, %v835_v32  ;;  %v448_v1 = vpop.f32.mrb[11].mxu1 }
 0x1c7   :  { %1058 = vmatprep.mubr.f32.mxu0 %v485_v62  ;;  %v449_v2 = vadd.f32 %v835_v32, %v448_v1 }
 0x1c8   :  { %1059 = vmatmul.mubr.f32.gmra.mrb[24].mxu0 %v486_v61  ;;  %v488_v3 = vmax.f32 %v454_v0, 0.0 }
 0x1c9   :  { %v487_v4 = vmax.f32 %v449_v2, 0.0  ;;  %v1010_v5 = vpop.f32.mrb[12].mxu1 }
 0x1ca   :  { %v464_v6 = vadd.f32 %v1010_v5, %v835_v32  ;;  %v458_v7 = vpop.f32.mrb[13].mxu1 }
 0x1cb   :  { %1061 = vmatprep.mubr.f32.mxu0 %v487_v4  ;;  %v459_v8 = vadd.f32 %v835_v32, %v458_v7 }
 0x1cc   :  { %1062 = vmatmul.mubr.f32.gmra.mrb[26].mxu0 %v488_v3  ;;  %v490_v9 = vmax.f32 %v464_v6, 0.0 }
 0x1cd   :  { %v489_v10 = vmax.f32 %v459_v8, 0.0  ;;  %v1013_v11 = vpop.f32.mrb[14].mxu1 }
 0x1ce   :  { %v474_v12 = vadd.f32 %v1013_v11, %v835_v32  ;;  %v468_v13 = vpop.f32.mrb[15].mxu1 }
 0x1cf   :  { %1064 = vmatprep.mubr.f32.mxu0 %v489_v10  ;;  %v469_v14 = vadd.f32 %v835_v32, %v468_v13  ;;  %v677_v13 = vld [vmem:[%s1467_s7] sm:$0x1] }
 0x1d0   :  { %1065 = vmatmul.mubr.f32.gmra.mrb[28].mxu0 %v490_v9  ;;  %v492_v15 = vmax.f32 %v474_v12, 0.0 }
 0x1d1   :  { %v491_v16 = vmax.f32 %v469_v14, 0.0  ;;  %v679_v14 = vstv %s1468_s8 }
 0x1d3   :  { %1067 = vmatprep.mubr.f32.mxu0 %v491_v16 }
 0x1d4   :  { %1068 = vmatmul.mubr.f32.gmra.mrb[30].mxu0 %v492_v15 }
 0x28b   :  { %v1048_v20 = vpop.f32.mrb[16].mxu0 }
 0x28c   :  { %v588_v21 = vadd.f32 %v1048_v20, %v852_v19  ;;  %v582_v22 = vpop.f32.mrb[17].mxu0 }
 0x28d   :  { %v583_v23 = vadd.f32 %v852_v19, %v582_v22 }
 0x28e   :  { %v662_v24 = vmax.f32 %v588_v21, 0.0 }
 0x28f   :  { %v661_v25 = vmax.f32 %v583_v23, 0.0  ;;  %v1051_v26 = vpop.f32.mrb[18].mxu0 }
 0x290   :  { %v598_v27 = vadd.f32 %v1051_v26, %v852_v19  ;;  %v592_v28 = vpop.f32.mrb[19].mxu0 }
 0x291   :  { %v1146_v30 = vpack.c.bf16 %v662_v24, %v661_v25  ;;  %v593_v31 = vadd.f32 %v852_v19, %v592_v28 }
 0x292   :  { %v664_v32 = vmax.f32 %v598_v27, 0.0 }
 0x293   :  { %v663_v33 = vmax.f32 %v593_v31, 0.0  ;;  %1148 = vmatpush3.bf16.xpose.msk.msra.mxu1 %vm1414_vm5, %v1146_v30  ;;  %v1054_v34 = vpop.f32.mrb[20].mxu0 }
 0x294   :  { %v608_v35 = vadd.f32 %v1054_v34, %v852_v19  ;;  %v602_v36 = vpop.f32.mrb[21].mxu0  ;;  %1149 = vmatprep.subr.bf16.mxu1 %v1205_v17 }
 0x295   :  { %v1150_v37 = vpack.c.bf16 %v664_v32, %v663_v33  ;;  %v603_v38 = vadd.f32 %v852_v19, %v602_v36 }
 0x296   :  { %v666_v39 = vmax.f32 %v608_v35, 0.0 }
 0x297   :  { %v665_v40 = vmax.f32 %v603_v38, 0.0  ;;  %v1057_v41 = vpop.f32.mrb[22].mxu0 }
 0x298   :  { %v618_v42 = vadd.f32 %v1057_v41, %v852_v19  ;;  %v612_v43 = vpop.f32.mrb[23].mxu0 }
 0x299   :  { %v1154_v44 = vpack.c.bf16 %v666_v39, %v665_v40  ;;  %v613_v45 = vadd.f32 %v852_v19, %v612_v43 }
 0x29a   :  { %v668_v46 = vmax.f32 %v618_v42, 0.0 }
 0x29b   :  { %1152 = vmatpush3.bf16.xpose.msk.msra.mxu1 %vm1414_vm5, %v1150_v37  ;;  %v667_v47 = vmax.f32 %v613_v45, 0.0  ;;  %v1060_v48 = vpop.f32.mrb[24].mxu0 }
 0x29c   :  { %1153 = vmatprep.subr.bf16.mxu1 %v1205_v17  ;;  %v628_v49 = vadd.f32 %v1060_v48, %v852_v19  ;;  %v622_v50 = vpop.f32.mrb[25].mxu0 }
 0x29d   :  { %v1158_v51 = vpack.c.bf16 %v668_v46, %v667_v47  ;;  %v623_v52 = vadd.f32 %v852_v19, %v622_v50 }
 0x29e   :  { %v670_v53 = vmax.f32 %v628_v49, 0.0 }
 0x29f   :  { %v669_v54 = vmax.f32 %v623_v52, 0.0  ;;  %v1063_v55 = vpop.f32.mrb[26].mxu0 }
 0x2a0   :  { %v638_v56 = vadd.f32 %v1063_v55, %v852_v19  ;;  %v632_v57 = vpop.f32.mrb[27].mxu0 }
 0x2a1   :  { %v1162_v58 = vpack.c.bf16 %v670_v53, %v669_v54  ;;  %v633_v59 = vadd.f32 %v852_v19, %v632_v57 }
 0x2a2   :  { %v672_v60 = vmax.f32 %v638_v56, 0.0 }
 0x2a3   :  { %1156 = vmatpush3.bf16.xpose.msk.msra.mxu1 %vm1414_vm5, %v1154_v44  ;;  %v671_v61 = vmax.f32 %v633_v59, 0.0  ;;  %v1066_v62 = vpop.f32.mrb[28].mxu0 }
 0x2a4   :  { %1157 = vmatprep.subr.bf16.mxu1 %v1205_v17  ;;  %v648_v63 = vadd.f32 %v1066_v62, %v852_v19  ;;  %v642_v0 = vpop.f32.mrb[29].mxu0 }
 0x2a5   :  { %v1166_v1 = vpack.c.bf16 %v672_v60, %v671_v61  ;;  %v643_v2 = vadd.f32 %v852_v19, %v642_v0 }
 0x2a6   :  { %v674_v3 = vmax.f32 %v648_v63, 0.0 }
 0x2a7   :  { %v673_v4 = vmax.f32 %v643_v2, 0.0  ;;  %v1069_v5 = vpop.f32.mrb[30].mxu0 }
 0x2a8   :  { %v658_v6 = vadd.f32 %v1069_v5, %v852_v19  ;;  %v652_v7 = vpop.f32.mrb[31].mxu0 }
 0x2a9   :  { %v1170_v8 = vpack.c.bf16 %v674_v3, %v673_v4  ;;  %v653_v9 = vadd.f32 %v852_v19, %v652_v7 }
 0x2aa   :  { %v676_v10 = vmax.f32 %v658_v6, 0.0 }
 0x2ab   :  { %1160 = vmatpush3.bf16.xpose.msk.msra.mxu1 %vm1414_vm5, %v1158_v51  ;;  %v675_v11 = vmax.f32 %v653_v9, 0.0 }
 0x2ac   :  { %1161 = vmatprep.subr.bf16.mxu1 %v1205_v17 }
 0x2ad   :  { %v1174_v12 = vpack.c.bf16 %v676_v10, %v675_v11 }
 0x2b3   :  { %1164 = vmatpush3.bf16.xpose.msk.msra.mxu1 %vm1414_vm5, %v1162_v58 }
 0x2b4   :  { %1165 = vmatprep.subr.bf16.mxu1 %v1205_v17 }
 0x2bb   :  { %1168 = vmatpush3.bf16.xpose.msk.msra.mxu1 %vm1414_vm5, %v1166_v1 }
 0x2bc   :  { %1169 = vmatprep.subr.bf16.mxu1 %v1205_v17 }
 0x2c3   :  { %1172 = vmatpush3.bf16.xpose.msk.msra.mxu1 %vm1414_vm5, %v1170_v8 }
 0x2c4   :  { %1173 = vmatprep.subr.bf16.mxu1 %v1205_v17 }
 0x2cb   :  { %1176 = vmatpush3.bf16.xpose.msk.msra.mxu1 %vm1414_vm5, %v1174_v12 }
 0x2d2   :  { %1103 = vmatmul.mubr.msk.f32.vlgmr.msra.gmra.mrb[16].mxu1 %vm680_vm4, %v677_v13 }
 0x3a5   :  { %v798_v15 = vpop.f32.mrb[16].mxu1 }
 0x3a6   :  { %v799_v16 = vadd.f32 %v798_v15, %v679_v14  ;;  %v1104_v18 = vpop.f32.mrb[17].mxu1 }
 0x3a8   :  { %802 = vst [vmem:[#allocation3] sm:$0x1] %v799_v16 }
 0x3a9   :  { %1192 = shalt.err (!%p1189_p4)
}
 0x3aa   :  { %s1193_s23 = scalar_lea.hbm %s1469_s9, 16 }
 0x3ab   :  { %p1194_p5 = scmp.ne.s32.totalorder %s1469_s9, %s1193_s23  ;;  %p1197_p6 = scmp.lt.u32.totalorder %s1193_s23, %s1469_s9 }
 0x3ad   :  { %p1199_p7 = pnand %p1197_p6, %p1194_p5 }
 0x3af   :  { %1202 = shalt.err (!%p1199_p7)
}
 0x3b0   :  { %812 = dma.vmem_to_hbm [thread:$0]  %s810_s19, 16, %s1469_s9, [#allocation4]  }
 0x3b1   :  { %1203 = dma.done.wait [#allocation4], 16  }
 0x3b2   :  { %1204 = vsyncadd [#allocation4], 4294967280 }
 0x3b3   :  { %816 = vsyncpa [#allocation4], 1 }

</bundles_post_ra>
